<compile_context>
chip_gen: v6e
topology: v6e:2x2x1
jax: 0.10.0
libtpu: 0.0.40
codegen_flags: <defaults>
</compile_context>

<pallas_src>
import functools

import jax
import jax.numpy as jnp
from jax.experimental import pallas as pl
from jax.experimental.pallas import tpu as pltpu


def _wce_body(x_ref, t_ref, w_ref, out_ref, acc_ref, *, hw, tile_p, tps, need_mask):
    """x_ref: (1,C,T) logits (native dtype); t_ref: (1,1,T) int; w_ref: (1,1,T) or None;
    out_ref: (1,1,1) f32 partial sum; acc_ref: (1,T) f32 per-lane accumulator."""
    k = pl.program_id(2)

    @pl.when(k == 0)
    def _():
        acc_ref[...] = jnp.zeros_like(acc_ref)

    x = x_ref[0].astype(jnp.float32)              # (C, T): classes on sublanes, pixels on lanes
    t = t_ref[0].astype(jnp.int32)                # (1, T)

    # numerically stable log-sum-exp over the class (sublane) axis
    m = jnp.max(x, axis=0, keepdims=True)                                  # (1, T)
    lse = jnp.log(jnp.sum(jnp.exp(x - m), axis=0, keepdims=True)) + m      # (1, T)

    cls = jax.lax.broadcasted_iota(jnp.int32, x.shape, dimension=0)        # (C, T)
    logit_t = jnp.sum(jnp.where(cls == t, x, 0.0), axis=0, keepdims=True)  # (1, T)

    loss = lse - logit_t                                                   # (1, T)
    if w_ref is not None:
        loss = loss * w_ref[0].astype(jnp.float32)

    if need_mask:  # static flag: only emitted when some tile overruns HW
        global_tile = pl.program_id(1) * tps + k
        full_tiles = hw // tile_p   # tiles strictly inside [0, HW)

        @pl.when(global_tile >= full_tiles)     # ragged boundary tile or fully-OOB tile
        def _():
            col = jax.lax.broadcasted_iota(jnp.int32, loss.shape, dimension=1)
            valid = (global_tile * tile_p + col) < hw
            # mask the final loss itself: OOB lanes may hold garbage/NaN logits or weights
            acc_ref[...] += jnp.where(valid, loss, 0.0)

        @pl.when(global_tile < full_tiles)      # full interior tile: no mask cost
        def _():
            acc_ref[...] += loss
    else:
        acc_ref[...] += loss

    @pl.when(k == pl.num_programs(2) - 1)
    def _():
        out_ref[...] = jnp.sum(acc_ref[...]).reshape(1, 1, 1)


def _wce_kernel_weighted(x_ref, t_ref, w_ref, out_ref, acc_ref, **kw):
    _wce_body(x_ref, t_ref, w_ref, out_ref, acc_ref, **kw)


def _wce_kernel_noweight(x_ref, t_ref, out_ref, acc_ref, **kw):
    _wce_body(x_ref, t_ref, None, out_ref, acc_ref, **kw)


def _round_up(v, m):
    return (v + m - 1) // m * m


def weighted_cross_entropy_loss(inputs, targets, weight=None, *,
                                tile_p=None, pixel_splits=None):
    """inputs: (N, C, H, W) float logits; targets: (N, H, W) int; weight: (N, H, W) or None.

    Returns mean over all N*H*W elements of (per-pixel CE loss * weight), matching
    torch.mean(F.cross_entropy(..., reduction='none') * weight)  -- NOT the class-weight
    normalized mean of F.cross_entropy(weight=...).
    """
    N, C, H, W = inputs.shape
    HW = H * W
    M = N * HW
    itemsize = jnp.dtype(inputs.dtype).itemsize
    weighted = weight is not None

    # Transpose-free layout (contiguous reshapes only): pixels on lanes, classes on sublanes.
    x = inputs.reshape(N, C, HW)
    t = targets.reshape(N, 1, HW)
    if jnp.dtype(t.dtype).itemsize > 4:
        t = t.astype(jnp.int32)
    if weighted:
        w = weight.reshape(N, 1, HW)          # native dtype; cast to f32 in-kernel

    # --- pixel tile: multiple of 128, double-buffered VMEM working set <= ~12 MiB ---
    sub_mult = max(1, 32 // itemsize)                       # sublane packing (8 f32 / 16 bf16 / 32 i8)
    logits_vmem_pp = _round_up(C, sub_mult) * itemsize      # padded VMEM bytes/pixel for logits block
    # 2 pipeline buffers of (logits + targets + weight) blocks + the f32 accumulator;
    # the (1, tile_p) blocks are stored 8-sublane padded -> 32 bytes/pixel each.
    per_pixel = 2 * (logits_vmem_pp + 32 + (32 if weighted else 0)) + 32
    if tile_p is None:
        tile_p = (12 * 1024 * 1024 // per_pixel) // 128 * 128
        tile_p = max(128, min(65536, tile_p))
    tile_p = int(min(tile_p, pl.cdiv(HW, 128) * 128))

    tiles_total = pl.cdiv(HW, tile_p)
    if pixel_splits is None:
        # split the pixel range so both v7x TensorCores get work even for N == 1 / odd N
        pixel_splits = 2 if tiles_total >= 2 else 1
    S = int(max(1, min(pixel_splits, tiles_total)))
    tps = pl.cdiv(tiles_total, S)                           # tiles per split
    need_mask = (HW % tile_p != 0) or (S * tps != tiles_total)

    last_tile = tiles_total - 1
    # Clamp the block index so fully-out-of-range (s,k) combinations DMA valid data;
    # their lanes are masked to zero in-kernel.
    x_spec = pl.BlockSpec((1, C, tile_p),
                          lambda n, s, k: (n, 0, jnp.minimum(s * tps + k, last_tile)))
    s_spec = pl.BlockSpec((1, 1, tile_p),
                          lambda n, s, k: (n, 0, jnp.minimum(s * tps + k, last_tile)))
    out_spec = pl.BlockSpec((1, 1, 1), lambda n, s, k: (n * S + s, 0, 0))
    out_shape = jax.ShapeDtypeStruct((N * S, 1, 1), jnp.float32)
    scratch = [pltpu.VMEM((1, tile_p), jnp.float32)]
    grid = (N, S, tps)

    # VMEM limit from the real sublane-padded working set + headroom; cap at 48 MiB so it
    # fits under v7x's 64 MiB/TC with room for Mosaic internal scratch (v5e/v6e have 128 MiB).
    working_set = per_pixel * tile_p
    vmem_limit = int(min(48 * 1024 * 1024, max(16 * 1024 * 1024, working_set + (8 << 20))))
    cp = pltpu.CompilerParams(
        dimension_semantics=("parallel", "parallel", "arbitrary"),
        vmem_limit_bytes=vmem_limit,
    )

    static = dict(hw=HW, tile_p=tile_p, tps=int(tps), need_mask=bool(need_mask))
    if weighted:
        kernel = functools.partial(_wce_kernel_weighted, **static)
        in_specs = [x_spec, s_spec, s_spec]
        args = (x, t, w)
    else:
        kernel = functools.partial(_wce_kernel_noweight, **static)
        in_specs = [x_spec, s_spec]
        args = (x, t)

    partials = pl.pallas_call(
        kernel,
        out_shape=out_shape,
        grid_spec=pltpu.PrefetchScalarGridSpec(
            num_scalar_prefetch=0,
            grid=grid,
            in_specs=in_specs,
            out_specs=out_spec,
            scratch_shapes=scratch,
        ),
        compiler_params=cp,
    )(*args)

    # mean over all N*H*W elements (matches torch.mean(loss * weight))
    return jnp.sum(partials) / jnp.float32(M)


def _reference(inputs, targets, weight=None):
    # pure-JAX reference matching F.cross_entropy(..., reduction='none') on NCHW + mean
    logp = jax.nn.log_softmax(inputs.astype(jnp.float32), axis=1)               # (N, C, H, W)
    nll = -jnp.take_along_axis(logp, targets[:, None, :, :], axis=1)[:, 0]      # (N, H, W)
    if weight is not None:
        nll = nll * weight.astype(jnp.float32)
    return jnp.mean(nll)


if __name__ == "__main__":
    key = jax.random.PRNGKey(0)
    k1, k2, k3 = jax.random.split(key, 3)

    # --- main case: N=2, C=4, H=W=16 ---
    N, C, H, W = 2, 4, 16, 16
    inputs = jax.random.normal(k1, (N, C, H, W), dtype=jnp.float32)
    targets = jax.random.randint(k2, (N, H, W), 0, C, dtype=jnp.int32)
    weight = jax.random.uniform(k3, (N, H, W), dtype=jnp.float32)

    loss = jax.block_until_ready(weighted_cross_entropy_loss(inputs, targets, weight))
    ref = _reference(inputs, targets, weight)
    assert jnp.allclose(loss, ref, rtol=1e-5, atol=1e-5), (loss, ref)

    # weight=None path (separate kernel, no weight DMA)
    loss_nw = jax.block_until_ready(weighted_cross_entropy_loss(inputs, targets, None))
    ref_nw = _reference(inputs, targets, None)
    assert jnp.allclose(loss_nw, ref_nw, rtol=1e-5, atol=1e-5), (loss_nw, ref_nw)

    # --- ragged spatial size (< 128 pixels) exercises in-kernel boundary masking ---
    H2, W2 = 10, 10
    inputs2 = jax.random.normal(k1, (N, C, H2, W2), dtype=jnp.float32)
    targets2 = jax.random.randint(k2, (N, H2, W2), 0, C, dtype=jnp.int32)
    weight2 = jax.random.uniform(k3, (N, H2, W2), dtype=jnp.float32)
    for wgt in (weight2, None):
        got = jax.block_until_ready(weighted_cross_entropy_loss(inputs2, targets2, wgt))
        want = _reference(inputs2, targets2, wgt)
        assert jnp.allclose(got, want, rtol=1e-5, atol=1e-5), (got, want)

    # --- multi-tile + pixel-split path (N=1, 3 tiles split across S=2, incl. clamped OOB tile) ---
    H3, W3 = 16, 24   # HW = 384 = 3 tiles of 128
    inputs3 = jax.random.normal(k1, (1, C, H3, W3), dtype=jnp.float32)
    targets3 = jax.random.randint(k2, (1, H3, W3), 0, C, dtype=jnp.int32)
    weight3 = jax.random.uniform(k3, (1, H3, W3), dtype=jnp.float32)
    for wgt in (weight3, None):
        got = jax.block_until_ready(
            weighted_cross_entropy_loss(inputs3, targets3, wgt, tile_p=128, pixel_splits=2))
        want = _reference(inputs3, targets3, wgt)
        assert jnp.allclose(got, want, rtol=1e-5, atol=1e-5), (got, want)

    # --- bf16 logits: DMA'd in native dtype, f32 accumulation in-kernel ---
    inputs_bf = inputs.astype(jnp.bfloat16)
    got_bf = jax.block_until_ready(weighted_cross_entropy_loss(inputs_bf, targets, weight))
    want_bf = _reference(inputs_bf, targets, weight)
    assert jnp.allclose(got_bf, want_bf, rtol=5e-3, atol=5e-3), (got_bf, want_bf)

    print("KERNEL_OK")
</pallas_src>

<mosaic_0001>
module attributes {stable_mosaic.version = 11 : i64} {
  func.func @_wce_kernel_weighted(%arg0: i32, %arg1: i32, %arg2: i32, %arg3: memref<1x4x256xf32, #tpu.memory_space<vmem>>, %arg4: memref<1x1x256xi32, #tpu.memory_space<vmem>>, %arg5: memref<1x1x256xf32, #tpu.memory_space<vmem>>, %arg6: memref<1x1x1xf32, #tpu.memory_space<vmem>>, %arg7: memref<1x256xf32, #tpu.memory_space<vmem>>) attributes {dimension_semantics = [#tpu.dimension_semantics<parallel>, #tpu.dimension_semantics<parallel>, #tpu.dimension_semantics<arbitrary>], iteration_bounds = array<i64: 2, 1, 1>, scalar_prefetch = 0 : i64, scratch_operands = 1 : i64, tpu.core_type = #tpu.core_type<tc>, window_params = [{transform_indices = @transform_0, window_bounds = array<i64: 1, 4, 256>}, {transform_indices = @transform_1, window_bounds = array<i64: 1, 1, 256>}, {transform_indices = @transform_2, window_bounds = array<i64: 1, 1, 256>}, {transform_indices = @transform_3, window_bounds = array<i64: 1, 1, 1>}]} {
    %c0_i32 = arith.constant 0 : i32
    %0 = arith.cmpi eq, %arg2, %c0_i32 : i32
    %1 = arith.extui %0 : i1 to i32
    %c0_i32_0 = arith.constant 0 : i32
    %2 = arith.cmpi ne, %1, %c0_i32_0 : i32
    scf.if %2 {
      %cst_18 = arith.constant 0.000000e+00 : f32
      %33 = vector.broadcast %cst_18 : f32 to vector<1x256xf32>
      %c0_19 = arith.constant 0 : index
      %c0_20 = arith.constant 0 : index
      %34 = vector.load %arg7[%c0_19, %c0_20] : memref<1x256xf32, #tpu.memory_space<vmem>>, vector<1x256xf32>
      tpu.vector_store %arg7[%c0_19, %c0_20], %33 {strides = array<i32>} : memref<1x256xf32, #tpu.memory_space<vmem>>, vector<1x256xf32>,
    } else {
    }
    %c0 = arith.constant 0 : index
    %c0_1 = arith.constant 0 : index
    %c0_2 = arith.constant 0 : index
    %3 = vector.load %arg3[%c0, %c0_1, %c0_2] : memref<1x4x256xf32, #tpu.memory_space<vmem>>, vector<1x4x256xf32>
    %4 = vector.shape_cast %3 : vector<1x4x256xf32> to vector<4x256xf32>
    %c0_3 = arith.constant 0 : index
    %c0_4 = arith.constant 0 : index
    %c0_5 = arith.constant 0 : index
    %5 = vector.load %arg4[%c0_3, %c0_4, %c0_5] : memref<1x1x256xi32, #tpu.memory_space<vmem>>, vector<1x1x256xi32>
    %6 = vector.shape_cast %5 : vector<1x1x256xi32> to vector<1x256xi32>
    %cst = arith.constant dense<0xFF800000> : vector<256xf32>
    %7 = vector.multi_reduction <maximumf>, %4, %cst [0] : vector<4x256xf32> to vector<256xf32>
    %8 = vector.shape_cast %7 : vector<256xf32> to vector<1x256xf32>
    %9 = vector.broadcast %8 : vector<1x256xf32> to vector<4x256xf32>
    %10 = arith.subf %4, %9 : vector<4x256xf32>
    %11 = math.exp %10 : vector<4x256xf32>
    %cst_6 = arith.constant dense<0.000000e+00> : vector<256xf32>
    %12 = vector.multi_reduction <add>, %11, %cst_6 [0] : vector<4x256xf32> to vector<256xf32>
    %13 = vector.shape_cast %12 : vector<256xf32> to vector<1x256xf32>
    %14 = math.log %13 : vector<1x256xf32>
    %15 = arith.addf %14, %8 : vector<1x256xf32>
    %16 = tpu.iota {dimensions = array<i32: 0>} : vector<4x256xi32>
    %17 = vector.broadcast %6 : vector<1x256xi32> to vector<4x256xi32>
    %18 = arith.cmpi eq, %16, %17 : vector<4x256xi32>
    %cst_7 = arith.constant 0.000000e+00 : f32
    %19 = vector.broadcast %cst_7 : f32 to vector<4x256xf32>
    %20 = arith.select %18, %4, %19 : vector<4x256xi1>, vector<4x256xf32>
    %cst_8 = arith.constant dense<0.000000e+00> : vector<256xf32>
    %21 = vector.multi_reduction <add>, %20, %cst_8 [0] : vector<4x256xf32> to vector<256xf32>
    %22 = vector.shape_cast %21 : vector<256xf32> to vector<1x256xf32>
    %23 = arith.subf %15, %22 : vector<1x256xf32>
    %c0_9 = arith.constant 0 : index
    %c0_10 = arith.constant 0 : index
    %c0_11 = arith.constant 0 : index
    %24 = vector.load %arg5[%c0_9, %c0_10, %c0_11] : memref<1x1x256xf32, #tpu.memory_space<vmem>>, vector<1x1x256xf32>
    %25 = vector.shape_cast %24 : vector<1x1x256xf32> to vector<1x256xf32>
    %26 = arith.mulf %23, %25 : vector<1x256xf32>
    %c0_12 = arith.constant 0 : index
    %c0_13 = arith.constant 0 : index
    %27 = vector.load %arg7[%c0_12, %c0_13] : memref<1x256xf32, #tpu.memory_space<vmem>>, vector<1x256xf32>
    %28 = arith.addf %27, %26 : vector<1x256xf32>
    %c0_14 = arith.constant 0 : index
    %c0_15 = arith.constant 0 : index
    %29 = vector.load %arg7[%c0_14, %c0_15] : memref<1x256xf32, #tpu.memory_space<vmem>>, vector<1x256xf32>
    tpu.vector_store %arg7[%c0_14, %c0_15], %28 {strides = array<i32>} : memref<1x256xf32, #tpu.memory_space<vmem>>, vector<1x256xf32>,
    %c0_i32_16 = arith.constant 0 : i32
    %30 = arith.cmpi eq, %arg2, %c0_i32_16 : i32
    %31 = arith.extui %30 : i1 to i32
    %c0_i32_17 = arith.constant 0 : i32
    %32 = arith.cmpi ne, %31, %c0_i32_17 : i32
    scf.if %32 {
      %c0_18 = arith.constant 0 : index
      %c0_19 = arith.constant 0 : index
      %33 = vector.load %arg7[%c0_18, %c0_19] : memref<1x256xf32, #tpu.memory_space<vmem>>, vector<1x256xf32>
      %34 = vector.shape_cast %33 : vector<1x256xf32> to vector<1x1x256xf32>
      %cst_20 = arith.constant dense<0.000000e+00> : vector<1xf32>
      %35 = vector.multi_reduction <add>, %34, %cst_20 [1, 2] : vector<1x1x256xf32> to vector<1xf32>
      %36 = vector.shape_cast %35 : vector<1xf32> to vector<1x1x1xf32>
      %37 = vector.extract %36[0, 0, 0] : f32 from vector<1x1x1xf32>
      %38 = vector.broadcast %37 : f32 to vector<1x1x1xf32>
      %c0_21 = arith.constant 0 : index
      %c0_22 = arith.constant 0 : index
      %c0_23 = arith.constant 0 : index
      %39 = vector.load %arg6[%c0_21, %c0_22, %c0_23] : memref<1x1x1xf32, #tpu.memory_space<vmem>>, vector<1x1x1xf32>
      tpu.vector_store %arg6[%c0_21, %c0_22, %c0_23], %38 {strides = array<i32>} : memref<1x1x1xf32, #tpu.memory_space<vmem>>, vector<1x1x1xf32>,
    } else {
    }
    return
  }
  func.func @transform_0(%arg0: i32, %arg1: i32, %arg2: i32) -> (i32, i32, i32) {
    %c1_i32 = arith.constant 1 : i32
    %0 = arith.muli %arg1, %c1_i32 : i32
    %1 = arith.addi %0, %arg2 : i32
    %c0_i32 = arith.constant 0 : i32
    %2 = arith.minsi %1, %c0_i32 : i32
    %c0_i32_0 = arith.constant 0 : i32
    %c0_i32_1 = arith.constant 0 : i32
    return %arg0, %c0_i32_0, %2 : i32, i32, i32
  }
  func.func @transform_1(%arg0: i32, %arg1: i32, %arg2: i32) -> (i32, i32, i32) {
    %c1_i32 = arith.constant 1 : i32
    %0 = arith.muli %arg1, %c1_i32 : i32
    %1 = arith.addi %0, %arg2 : i32
    %c0_i32 = arith.constant 0 : i32
    %2 = arith.minsi %1, %c0_i32 : i32
    %c0_i32_0 = arith.constant 0 : i32
    %c0_i32_1 = arith.constant 0 : i32
    return %arg0, %c0_i32_0, %2 : i32, i32, i32
  }
  func.func @transform_2(%arg0: i32, %arg1: i32, %arg2: i32) -> (i32, i32, i32) {
    %c1_i32 = arith.constant 1 : i32
    %0 = arith.muli %arg1, %c1_i32 : i32
    %1 = arith.addi %0, %arg2 : i32
    %c0_i32 = arith.constant 0 : i32
    %2 = arith.minsi %1, %c0_i32 : i32
    %c0_i32_0 = arith.constant 0 : i32
    %c0_i32_1 = arith.constant 0 : i32
    return %arg0, %c0_i32_0, %2 : i32, i32, i32
  }
  func.func @transform_3(%arg0: i32, %arg1: i32, %arg2: i32) -> (i32, i32, i32) {
    %c1_i32 = arith.constant 1 : i32
    %0 = arith.muli %arg0, %c1_i32 : i32
    %1 = arith.addi %0, %arg1 : i32
    %c0_i32 = arith.constant 0 : i32
    %c0_i32_0 = arith.constant 0 : i32
    %c0_i32_1 = arith.constant 0 : i32
    return %1, %c0_i32, %c0_i32_0 : i32, i32, i32
  }
}

</mosaic_0001>

<bundles_post_ra>
// kernel: tpu_custom_call.1
= control target key start
LH: loop header
LB: loop body
LE: loop exit
PB: predicated region body
PF: predicated region fallthrough
CT: control target
= control target key end

     0   :  { %s1054_s0 = inlined_call_operand.hbm [shape: f32[2,4,256], index: 0, kind: input, shape index: {}]   ;;  %s1055_s1 = inlined_call_operand.hbm [shape: s32[2,1,256], index: 1, kind: input, shape index: {}]   ;;  %s1056_s2 = inlined_call_operand.hbm [shape: f32[2,1,256], index: 2, kind: input, shape index: {}]   ;;  %s1057_s3 = inlined_call_operand.vmem [shape: f32[2,1,1], index: 3, kind: output, shape index: {}]  }
   0x1   :  { %1059 = sst [smem:[#allocation10_spill]] %s1055_s1 }
   0x2   :  { %8 = vsyncpa [#allocation4], 0 }
   0x3   :  { %10 = vsyncpa [#allocation4 + $0x1], 0 }
   0x4   :  { %11 = vsyncpa [#allocation6], 0 }
   0x5   :  { %13 = vsyncpa [#allocation6 + $0x1], 0  ;;  %s880_s12 = smov 0   ;;  %s882_s13 = smov 0  }
   0x6   :  { %s884_s14 = smov 0   ;;  %s886_s15 = smov 0  }
   0x7   :  { %s888_s16 = smov 0   ;;  %s890_s17 = smov 0  }
   0x8 LB: > { %s1058_s18 = sadd.s32 4294967295, %s853_s17   ;;  %s38_s19 = sadd.s32 1, %s849_s16  ;;  %s853_s17 = sphi %s890_s17, %s19_s17   ;;  %s849_s16 = sphi %s888_s16, %s1071_s16   ;;  %s845_s15 = sphi %s886_s15, %s1070_s15   ;;  %s841_s14 = sphi %s884_s14, %s1069_s14   ;;  %s837_s13 = sphi %s882_s13, %s1068_s13   ;;  %s833_s12 = sphi %s880_s12, %s1067_s12  }
   0x9   : > { %p40_p0 = scmp.ge.s32.totalorder %s38_s19, 2  ;;  %s53_s20 = sadd.s32 1, %s841_s14 }
   0xa   : > { %p60_p1 = scmp.ne.s32.totalorder %s841_s14, %s837_s13  ;;  %p61_p2 = scmp.eq.s32.totalorder %s853_s17, 0 }
   0xb   : > { %s1073_s19 = smov (%p40_p0, %s38_s19), 0  ;;  %p66_p4 = scmp.ne.s32.totalorder %s837_s13, %s833_s12 }
   0xc   : > { %p62_p3 = por %p61_p2, %p60_p1  ;;  %s48_s21 = ssub.s32 %s849_s16, %s1073_s19 }
   0xd   : > { %p67_p5 = scmp.eq.s32.totalorder %s1058_s18, 0  ;;  %p51_p6 = scmp.eq.s32.totalorder %s48_s21, 0 }
   0xe   : > { %p657_p8 = scmp.lt.s32.totalorder %s853_s17, 2  ;;  %s930_s24 = sand.u32 1, %s841_s14  }
   0xf   : > { %p921_p7 = por %p67_p5, %p66_p4  ;;  %s210_s26 = sand.u32 1, %s853_s17  }
  0x10   : > { %s927_s23 = scalar_select %p51_p6, %s841_s14, %s53_s20  }
  0x11   : > { %p932_p9 = pnand %p657_p8, %p62_p3  ;;  %s624_s27 = sshll.u32 %s930_s24, 1 }
  0x12   : > { %s637_s28 = sshll.u32 %s849_s16, 5  ;;  %s1062_s1 = sld [smem:[#allocation10_spill]] }
  0x13   : > { %s214_s5 = scalar_lea.vmem [#allocation5], %s624_s27  ;;  %s944_s7 = scalar_lea.sflag [#allocation6], %s210_s26 }
  0x14   : > { %s227_s6 = sshll.u32 %s214_s5, 4  ;;  %p717_p10 = pneg %p932_p9  ;;  %s228_s6 = int_to_ptr.vmem [resolvable:$true] %s227_s6 }
  0x15   : > { %s728_s8 = scalar_lea.vmem %s228_s6, 32  ;;  %s855_s9 = smov [#allocation5]  }
  0x16   : > { %p729_p11 = scmp.ne.s32.totalorder %s228_s6, %s728_s8  ;;  %s733_s10 = sshll.u32 %s855_s9, 4  ;;  %s734_s10 = int_to_ptr.vmem [resolvable:$false] %s733_s10 }
  0x17   : > { %s735_s11 = scalar_lea.vmem %s734_s10, 64  ;;  %p736_p0 = scmp.lt.s32.totalorder %s228_s6, %s734_s10 }
  0x18   : > { %s225_s4 = scalar_lea.hbm %s1062_s1, %s637_s28  ;;  %p731_p12 = pnand %p729_p11, %p717_p10 }
  0x19   : > { %p737_p1 = scmp.lt.s32.totalorder %s735_s11, %s728_s8 }
  0x1a   : > { %p732_p13 = pneg %p731_p12 }
  0x1b   : > { %p738_p2 = por %p737_p1, %p736_p0 }
  0x1d   : > { %p739_p3 = pnand %p738_p2, %p732_p13 }
  0x1f   : > { %742 = shalt.err (!%p739_p3)
}
  0x20   : > { %653 = dma.hbm_to_vmem [thread:$0]  (!%p932_p9), %s225_s4, 32, %s228_s6, %s944_s7  }
  0x21   : > { %s957_s21 = scalar_lea.hbm %s1056_s2, %s637_s28  ;;  %p630_p4 = scmp.ge.s32.totalorder %s853_s17, 1 }
  0x22   : > { %p256_p5 = scmp.lt.s32.totalorder %s853_s17, 3  ;;  %s621_s29 = sshll.u32 %s930_s24, 3 }
  0x23   : > { %s636_s30 = sshll.u32 %s849_s16, 7  ;;  %s190_s10 = scalar_lea.vmem [#allocation3], %s621_s29 }
  0x24   : > { %p961_p6 = pnand %p630_p4, %p256_p5  ;;  %s201_s9 = scalar_lea.hbm %s1054_s0, %s636_s30 }
  0x25   : > { %s203_s4 = sshll.u32 %s190_s10, 4  ;;  %s238_s6 = scalar_lea.vmem [#allocation7], %s624_s27  ;;  %s204_s4 = int_to_ptr.vmem [resolvable:$true] %s203_s4 }
  0x26   : > { %s251_s11 = sshll.u32 %s238_s6, 4  ;;  %s187_s28 = scalar_lea.sflag [#allocation4], %s930_s24  ;;  %s252_s11 = int_to_ptr.vmem [resolvable:$true] %s251_s11 }
  0x27   : > { %s756_s12 = scalar_lea.vmem %s204_s4, 128  ;;  %s856_s20 = smov [#allocation3]  }
  0x28   : > { %p757_p8 = scmp.ne.s32.totalorder %s204_s4, %s756_s12  ;;  %s761_s18 = sshll.u32 %s856_s20, 4  ;;  %s762_s18 = int_to_ptr.vmem [resolvable:$false] %s761_s18 }
  0x29   : > { %s763_s1 = scalar_lea.vmem %s762_s18, 256  ;;  %p764_p13 = scmp.lt.s32.totalorder %s204_s4, %s762_s18 }
  0x2a   : > { %p759_p11 = pnand %p757_p8, %p717_p10  ;;  %p765_p0 = scmp.lt.s32.totalorder %s763_s1, %s756_s12 }
  0x2c   : > { %p760_p12 = pneg %p759_p11  ;;  %p766_p1 = por %p765_p0, %p764_p13 }
  0x2e   : > { %p767_p2 = pnand %p766_p1, %p760_p12 }
  0x30   : > { %770 = shalt.err (!%p767_p2)
}
  0x31   : > { %650 = dma.hbm_to_vmem [thread:$0]  (!%p932_p9), %s201_s9, 128, %s204_s4, %s187_s28  }
  0x32   : > { %s784_s24 = scalar_lea.vmem %s252_s11, 32  ;;  %s857_s27 = smov [#allocation7]  }
  0x33   : > { %p785_p3 = scmp.ne.s32.totalorder %s252_s11, %s784_s24  ;;  %s789_s29 = sshll.u32 %s857_s27, 4  ;;  %s790_s29 = int_to_ptr.vmem [resolvable:$false] %s789_s29 }
  0x34   : > { %s791_s30 = scalar_lea.vmem %s790_s29, 64  ;;  %p792_p8 = scmp.lt.s32.totalorder %s252_s11, %s790_s29 }
  0x35   : > { %p787_p4 = pnand %p785_p3, %p717_p10  ;;  %p793_p11 = scmp.lt.s32.totalorder %s791_s30, %s784_s24 }
  0x37   : > { %p788_p5 = pneg %p787_p4  ;;  %p794_p13 = por %p793_p11, %p792_p8 }
  0x39   : > { %p795_p12 = pnand %p794_p13, %p788_p5 }
  0x3b   : > { %798 = shalt.err (!%p795_p12)
}
  0x3c   : > { %656 = dma.hbm_to_vmem [thread:$0]  (!%p932_p9), %s957_s21, 32, %s252_s11, %s944_s7  }
  0x3d   : > { %260 = sbr.rel (%p961_p6) target bundleno = 367 (0x16f), region = 32  ;;  %s988_s1 = sand.u32 (!%p961_p6), 1, %s837_s13  }
  0x3e   : > { %s631_s18 = sshll.u32 (!%p961_p6), %s988_s1, 3  ;;  %s263_s5 = scalar_lea.sflag (!%p961_p6), [#allocation4], %s988_s1 }
  0x3f   : > { %s266_s8 = scalar_lea.vmem (!%p961_p6), [#allocation3], %s631_s18 }
  0x42   : > { %824 = dma.done.wait (%p921_p7), %s263_s5, 128  }
  0x43   : > { %826 = vsyncadd (%p921_p7), %s263_s5, 4294967168  ;;  %s1064_s25 = sadd.s32 4294967295, %s853_s17   ;;  %s632_s21 = sshll.u32 %s988_s1, 1 }
  0x44   : > { %s271_s7 = sand.u32 1, %s1064_s25   ;;  %s275_s9 = scalar_lea.vmem [#allocation5], %s632_s21 }
  0x45   : > { %s272_s26 = scalar_lea.sflag [#allocation6], %s271_s7 }
  0x46   : > { %828 = dma.done.wait (%p921_p7), %s272_s26, 64  }
  0x47   : > { %830 = vsyncadd (%p921_p7), %s272_s26, 4294967232  ;;  %v337_v0 = vlaneseq  ;;  %v858_v2 = vmov 0.0   ;;  %vm347_vm1 = vcmask 1043456   ;;  %v342_v3 = vld [vmem:[%s266_s8] sm:$0xff]  ;;  %v343_v24 = vld [vmem:[%s275_s9] sm:$0x3] }
  0x48   : > { %v345_v4 = vcombine.high %v342_v3, %v342_v3  ;;  %v348_v5 = vsel %vm347_vm1, %v342_v3, -inf  ;;  %s284_s22 = scalar_lea.vmem [#allocation7], %s632_s21  ;;  %v859_v62 = vmov 1966171168   ;;  %vm476_vm4 = vcmask 1040384   ;;  %p329_p7 = scmp.lt.s32.totalorder %s845_s15, 1 }
  0x49   : > { %vm1005_vm0 = vcmp.lt.s32.totalorder %v337_v0, 256  ;;  %v349_v6 = vrot.slane %v348_v5, 4  ;;  %v393_v22 = vshrl.u32 %v337_v0, 7  ;;  %v422_v59 = vld [vmem:[%s284_s22] sm:$0x3]  ;;  %v441_v63 = vunpack.c.l.s4 %v859_v62 }
  0x4a   : > { %341 = vst.msk [vmem:[#allocation2] sm:$0x3] %vm1005_vm0, %v858_v2  ;;  %v355_v7 = vsel %vm347_vm1, %v345_v4, -inf  ;;  %s1075_s15 = smov (!%p329_p7, %s845_s15), 1  ;;  %vm490_vm5 = vcmask 0  }
  0x4b   : > { %v350_v8 = vmax.f32 %v348_v5, %v349_v6  ;;  %v356_v9 = vrot.slane %v355_v7, 4  ;;  %v1013_v23 = vsub.s32 0, %v393_v22  ;;  %v1015_v25 = vsub.s32 1, %v393_v22  ;;  %s331_s6 = scalar_lea.vmem %s1057_s3, %s1075_s15 }
  0x4d   : > { %v351_v10 = vrot.slane %v350_v8, 2  ;;  %v357_v11 = vmax.f32 %v355_v7, %v356_v9  ;;  %v397_v26 = vrot.slane %v343_v24, %v1013_v23  ;;  %v401_v27 = vrot.slane %v343_v24, %v1015_v25 }
  0x4e   : > { %v427_v5 = vrot.slane %v422_v59, %v1013_v23  ;;  %v442_v9 = vunpack.c.0.s8 %v441_v63 }
  0x4f   : > { %v352_v12 = vmax.f32 %v350_v8, %v351_v10  ;;  %v358_v13 = vrot.slane %v357_v11, 2  ;;  %vm402_vm2 = vcmp.eq.s32.totalorder %v393_v22, %v397_v26  ;;  %vm403_vm3 = vcmp.eq.s32.totalorder %v393_v22, %v401_v27 }
  0x50   : > { %v404_v32 = vsel %vm402_vm2, %v342_v3, 0.0  ;;  %v405_v36 = vsel %vm403_vm3, %v345_v4, 0.0  ;;  %v431_v8 = vrot.slane %v422_v59, %v1015_v25 }
  0x51   : > { %v353_v14 = vrot.slane %v352_v12, 1  ;;  %v359_v15 = vmax.f32 %v357_v11, %v358_v13  ;;  %v406_v37 = vsel %vm347_vm1, %v404_v32, 0.0  ;;  %v413_v40 = vsel %vm347_vm1, %v405_v36, 0.0 }
  0x52   : > { %v407_v43 = vrot.slane %v406_v37, 4  ;;  %v414_v46 = vrot.slane %v413_v40, 4  ;;  %v445_v13 = vsub.s32 %v442_v9, %v393_v22 }
  0x53   : > { %v354_v16 = vmax.f32 %v352_v12, %v353_v14  ;;  %v360_v17 = vrot.slane %v359_v15, 1 }
  0x54   : > { %v408_v49 = vadd.f32 %v407_v43, %v406_v37  ;;  %v415_v51 = vadd.f32 %v414_v46, %v413_v40 }
  0x55   : > { %v361_v18 = vmax.f32 %v359_v15, %v360_v17  ;;  %v436_v17 = vld [vmem:[#allocation2] sm:$0x3] }
  0x56   : > { %v409_v52 = vrot.slane %v408_v49, 2  ;;  %v416_v53 = vrot.slane %v415_v51, 2 }
  0x57   : > { %v364_v19 = vcombine.low %v354_v16, %v361_v18 }
  0x58   : > { %v410_v54 = vadd.f32 %v409_v52, %v408_v49  ;;  %v417_v55 = vadd.f32 %v416_v53, %v415_v51 }
  0x59   : > { %v366_v20 = vsub.f32 %v342_v3, %v364_v19 }
  0x5a   : > { %v411_v56 = vrot.slane %v410_v54, 1  ;;  %v418_v57 = vrot.slane %v417_v55, 1 }
  0x5b   : > { %v367_v21 = vmul.f32 1.442695, %v366_v20 }
  0x5c   : > { %v412_v61 = vadd.f32 %v411_v56, %v410_v54  ;;  %v419_v4 = vadd.f32 %v418_v57, %v417_v55 }
  0x5d   : > { %709 = vpow2.f32 %v367_v21 }
  0x6a   : > { %v710_v28 = vpop.eup %709 }
  0x6b   : > { %v370_v29 = vcombine.high %v710_v28, %v710_v28  ;;  %v372_v30 = vsel %vm347_vm1, %v710_v28, 0.0 }
  0x6c   : > { %v373_v31 = vrot.slane %v372_v30, 4 }
  0x6d   : > { %v379_v33 = vsel %vm347_vm1, %v370_v29, 0.0 }
  0x6e   : > { %v374_v34 = vadd.f32 %v373_v31, %v372_v30  ;;  %v380_v35 = vrot.slane %v379_v33, 4 }
  0x70   : > { %v375_v38 = vrot.slane %v374_v34, 2  ;;  %v381_v39 = vadd.f32 %v380_v35, %v379_v33 }
  0x72   : > { %v376_v41 = vadd.f32 %v375_v38, %v374_v34  ;;  %v382_v42 = vrot.slane %v381_v39, 2 }
  0x74   : > { %v377_v44 = vrot.slane %v376_v41, 1  ;;  %v383_v45 = vadd.f32 %v382_v42, %v381_v39 }
  0x76   : > { %v378_v47 = vadd.f32 %v377_v44, %v376_v41  ;;  %v384_v48 = vrot.slane %v383_v45, 1 }
  0x78   : > { %v385_v50 = vadd.f32 %v384_v48, %v383_v45  ;;  %711 = vlog2.f32 %v378_v47 }
  0x7a   : > { %713 = vlog2.f32 %v385_v50 }
  0x85   : > { %v712_v58 = vpop.eup %711 }
  0x86   : > { %v387_v60 = vmul.f32 0.6931472, %v712_v58 }
  0x87   : > { %v714_v0 = vpop.eup %713 }
  0x88   : > { %v389_v2 = vmul.f32 0.6931472, %v714_v0  ;;  %v390_v3 = vadd.f32 %v387_v60, %v354_v16 }
  0x8a   : > { %v391_v6 = vadd.f32 %v389_v2, %v361_v18  ;;  %v420_v7 = vsub.f32 %v390_v3, %v412_v61 }
  0x8c   : > { %v421_v10 = vsub.f32 %v391_v6, %v419_v4  ;;  %v434_v11 = vmul.f32 %v427_v5, %v420_v7 }
  0x8e   : > { %v435_v12 = vmul.f32 %v431_v8, %v421_v10 }
  0x90   : > { %v439_v14 = vcombine.low %v434_v11, %v435_v12 }
  0x92   : > { %v446_v15 = vrot.slane %v439_v14, %v445_v13 }
  0x94   : > { %v453_v19 = vrot.slane %v446_v15, %v445_v13 }
  0x96   : > { %v455_v20 = vadd.f32 %v453_v19, %v436_v17 }
  0x98   : > { %460 = vst.msk [vmem:[#allocation2] sm:$0x3] %vm1005_vm0, %v455_v20 }
  0x9f   : > { %v464_v16 = vld [vmem:[#allocation2] sm:$0x3] }
  0xa0   : > { %v469_v18 = vrot.slane %v464_v16, %v1013_v23  ;;  %v473_v21 = vrot.slane %v464_v16, %v1015_v25 }
  0xa2   : > { %v477_v24 = vsel %vm476_vm4, %v469_v18, 0.0  ;;  %v478_v26 = vsel %vm476_vm4, %v473_v21, 0.0 }
  0xa3   : > { %v479_v27 = vadd.f32 %v478_v26, %v477_v24 }
  0xa5   : > { %480 = vadd.xlane.f32.xlu0 %v479_v27 }
 0x12e   : > { %v481_v22 = vpop.xlane.xlu0 %480 }
 0x12f   : > { %v482_v28 = vrot.slane %v481_v22, 4 }
 0x131   : > { %v483_v29 = vadd.f32 %v482_v28, %v481_v22 }
 0x133   : > { %v484_v30 = vrot.slane %v483_v29, 2 }
 0x135   : > { %v485_v31 = vadd.f32 %v484_v30, %v483_v29 }
 0x137   : > { %v486_v32 = vrot.slane %v485_v31, 1 }
 0x139   : > { %v487_v1 = vadd.f32 %v486_v32, %v485_v31 }
 0x13b   : > { %639 = vpush %v487_v1 }
 0x16c   : > { %s640_s11 = spop %639 }
 0x16d   : > { %v489_v23 = vstv %s640_s11 }
 0x16e   : > { %491 = vst.msk [vmem:[%s331_s6] sm:$0x1] %vm490_vm5, %v489_v23 }
 0x16f PF: > { %s19_s17 = sadd.s32 1, %s853_s17   ;;  %s1067_s12 = smov %s837_s13 }
 0x170   : > { %p16_p9 = scmp.ge.s32.totalorder %s19_s17, 4   ;;  %s1068_s13 = smov %s841_s14 }
 0x171   : > { %s1069_s14 = smov %s927_s23  ;;  %s1070_s15 = smov %s849_s16 }
 0x172   : > { %s1071_s16 = smov %s1073_s19  ;;  %18 = sbr.rel (!%p16_p9) target bundleno = 8 (0x8), region = 104 }
 0x177   :  { %512 = vsyncpa [#allocation4], 1 }
 0x178   :  { %514 = vsyncpa [#allocation4 + $0x1], 1 }
 0x179   :  { %515 = vsyncpa [#allocation6], 1 }
 0x17a   :  { %517 = vsyncpa [#allocation6 + $0x1], 1 }

</bundles_post_ra>
